<compile_context>
chip_gen: v5e
topology: v5e:2x2
jax: 0.10.0
libtpu: 0.0.40
codegen_flags: <defaults>
</compile_context>

<pallas_src>
import functools
import math

import jax
import jax.numpy as jnp
from jax.experimental import pallas as pl
from jax.experimental.pallas import tpu as pltpu


def _round_up(x, m):
    return ((x + m - 1) // m) * m


def _pad2d(a, rows, cols):
    r, c = a.shape
    if rows == r and cols == c:
        return a
    return jnp.pad(a, ((0, rows - r), (0, cols - c)))


def _pick_tile(n, max_tile):
    """Largest power-of-two tile (multiple of 128, <= max_tile) keeping the
    padding of `n` within ~10% of the minimal (lane/sublane-legal) padding."""
    n_min = _round_up(n, 128)
    budget = max(n_min, int(n_min * 1.10))
    t = 128
    for cand in (256, 512, 1024, 2048):
        if cand > max_tile:
            break
        if _round_up(n, cand) <= budget:
            t = cand
    return t


# --------------------------------------------------------------------------
# Kernel 1: support = x @ W   (small, row-tiled; emits the bf16 stream)
# --------------------------------------------------------------------------
def _support_kernel(x_ref, w_ref, o_ref):
    o_ref[...] = jnp.dot(
        x_ref[...], w_ref[...], preferred_element_type=jnp.float32
    ).astype(o_ref.dtype)


def _compute_support(x_p, w_p, *, tr, out_dtype):
    n_pk, f_in_p = x_p.shape
    f_out_p = w_p.shape[1]
    return pl.pallas_call(
        _support_kernel,
        out_shape=jax.ShapeDtypeStruct((n_pk, f_out_p), out_dtype),
        grid=(n_pk // tr,),
        in_specs=[
            pl.BlockSpec((tr, f_in_p), lambda i: (i, 0)),       # x row-tile
            pl.BlockSpec((f_in_p, f_out_p), lambda i: (0, 0)),  # W (resident)
        ],
        out_specs=pl.BlockSpec((tr, f_out_p), lambda i: (i, 0)),
        compiler_params=pltpu.CompilerParams(
            dimension_semantics=("parallel",)),
    )(x_p, w_p)


# --------------------------------------------------------------------------
# Kernel 2 (dominant): out = relu?( adj @ support + b ), tiled over (i, k)
# --------------------------------------------------------------------------
def _adj_matmul_kernel(sup_ref, adj_ref, b_ref, o_ref, *scratch, apply_relu):
    # f32-output layer accumulates directly into o_ref (no scratch copy);
    # bf16-output layer accumulates into an f32 VMEM scratch.
    acc_ref = scratch[0] if scratch else o_ref
    k = pl.program_id(1)

    @pl.when(k == 0)
    def _():
        # Initialize with broadcast bias -> no separate bias add at the end.
        acc_ref[...] = jnp.broadcast_to(
            b_ref[...], acc_ref.shape).astype(acc_ref.dtype)

    acc_ref[...] += jnp.dot(
        adj_ref[...], sup_ref[...], preferred_element_type=jnp.float32)

    if apply_relu or scratch:
        @pl.when(k == pl.num_programs(1) - 1)
        def _():
            out = acc_ref[...]
            if apply_relu:
                out = jnp.maximum(out, 0.0)
            o_ref[...] = out.astype(o_ref.dtype)


def _adj_layer(support_p, adj_p, b, *, f_out, tm, tk, apply_relu, out_dtype):
    n_pm, n_pk = adj_p.shape
    f_out_p = support_p.shape[1]
    b_p = jnp.pad(b.astype(jnp.float32), (0, f_out_p - f_out)).reshape(1, f_out_p)

    grid = (n_pm // tm, n_pk // tk)
    adj_bytes = jnp.dtype(adj_p.dtype).itemsize
    sup_bytes = jnp.dtype(support_p.dtype).itemsize
    out_bytes = jnp.dtype(out_dtype).itemsize

    use_scratch = jnp.dtype(out_dtype) != jnp.dtype(jnp.float32)
    scratch_shapes = (
        [pltpu.VMEM((tm, f_out_p), jnp.float32)] if use_scratch else [])

    # VMEM budget: double-buffered streamed tiles + resident acc; 2x headroom.
    vmem_needed = (2 * (tm * tk * adj_bytes            # adj tile
                        + tk * f_out_p * sup_bytes     # support tile
                        + f_out_p * 4                  # bias
                        + tm * f_out_p * out_bytes)    # output tile
                   + (tm * f_out_p * 4 if use_scratch else 0))
    vmem_limit = int(min(48 * 1024 * 1024,
                         max(16 * 1024 * 1024, 2 * vmem_needed)))

    # Advisory cost estimate: adj stream dominates; support re-read per i-tile.
    flops = 2 * n_pm * n_pk * f_out_p
    bytes_accessed = (n_pm * n_pk * adj_bytes
                      + n_pk * f_out_p * sup_bytes * (n_pm // tm)
                      + n_pm * f_out_p * out_bytes
                      + f_out_p * 4)
    cost = pl.CostEstimate(flops=flops, transcendentals=0,
                           bytes_accessed=bytes_accessed)

    kernel = functools.partial(_adj_matmul_kernel, apply_relu=apply_relu)
    return pl.pallas_call(
        kernel,
        out_shape=jax.ShapeDtypeStruct((n_pm, f_out_p), out_dtype),
        grid=grid,
        in_specs=[
            pl.BlockSpec((tk, f_out_p), lambda i, k: (k, 0)),   # support tile
            pl.BlockSpec((tm, tk), lambda i, k: (i, k)),        # adj tile
            pl.BlockSpec((1, f_out_p), lambda i, k: (0, 0)),    # bias (resident)
        ],
        out_specs=pl.BlockSpec((tm, f_out_p), lambda i, k: (i, 0)),
        scratch_shapes=scratch_shapes,
        compiler_params=pltpu.CompilerParams(
            dimension_semantics=("parallel", "arbitrary"),
            vmem_limit_bytes=vmem_limit),
        cost_estimate=cost,
    )(support_p, adj_p, b_p)


# --------------------------------------------------------------------------
# Full GCN forward (eval mode)
# --------------------------------------------------------------------------
def init_gc_params(key, in_features, out_features):
    """Matches GraphConvolution.reset_parameters: U(-stdv, stdv), stdv=1/sqrt(out)."""
    stdv = 1.0 / math.sqrt(out_features)
    kw, kb = jax.random.split(key)
    w = jax.random.uniform(kw, (in_features, out_features), jnp.float32, -stdv, stdv)
    b = jax.random.uniform(kb, (out_features,), jnp.float32, -stdv, stdv)
    return w, b


def gcn_forward(x, adj, params, *, stream_dtype=jnp.bfloat16,
                max_tm=1024, max_tk=2048):
    (w1, b1), (w2, b2) = params
    n, f_in = x.shape
    nhid = w1.shape[1]
    nclass = w2.shape[1]

    # Adaptive tiles (big for large graphs, minimal padding for small ones).
    tm = _pick_tile(n, max_tm)
    tk = _pick_tile(n, max_tk)
    n_p = _round_up(n, math.lcm(tm, tk))
    tr = min(tk, 512)                       # support-kernel row tile (divides tk)

    f_in_p = _round_up(f_in, 128)
    nhid_p = _round_up(nhid, 128)
    nclass_p = _round_up(nclass, 128)

    # Pad + cast adj ONCE; it is the dominant HBM stream of both layers.
    adj_p = _pad2d(adj, n_p, n_p).astype(stream_dtype)

    # ---- layer 1: h = relu(adj @ (x @ w1) + b1) -> bf16 hidden activations
    x_p = _pad2d(x, n_p, f_in_p).astype(stream_dtype)
    w1_p = _pad2d(w1, f_in_p, nhid_p).astype(stream_dtype)
    sup1 = _compute_support(x_p, w1_p, tr=tr, out_dtype=stream_dtype)
    h_p = _adj_layer(sup1, adj_p, b1, f_out=nhid, tm=tm, tk=tk,
                     apply_relu=True, out_dtype=stream_dtype)
    # dropout: identity in eval mode.

    # ---- layer 2: out = adj @ (h @ w2) + b2 -> f32 logits
    w2_p = _pad2d(w2, nhid_p, nclass_p).astype(stream_dtype)
    sup2 = _compute_support(h_p, w2_p, tr=tr, out_dtype=stream_dtype)
    out_p = _adj_layer(sup2, adj_p, b2, f_out=nclass, tm=tm, tk=tk,
                       apply_relu=False, out_dtype=jnp.float32)

    return out_p[:n, :nclass]


def _ref_layer(x, w, adj, b, *, apply_relu):
    """Pure-JAX reference matching the kernel's bf16-stream / f32-acc math."""
    xb = x.astype(jnp.bfloat16)
    wb = w.astype(jnp.bfloat16)
    ab = adj.astype(jnp.bfloat16)
    support = jnp.dot(xb, wb, preferred_element_type=jnp.float32).astype(jnp.bfloat16)
    out = jnp.dot(ab, support, preferred_element_type=jnp.float32) + b
    return jnp.maximum(out, 0.0) if apply_relu else out


if __name__ == "__main__":
    # Small shapes consistent with the module's forward semantics.
    N = 32        # number of graph nodes
    NFEAT = 16
    NHID = 32
    NCLASS = 8

    key = jax.random.PRNGKey(0)
    kx, kadj, k1, k2 = jax.random.split(key, 4)

    x = jax.random.normal(kx, (N, NFEAT), jnp.float32)
    # symmetric row-normalized-ish dense adjacency
    a = jax.random.uniform(kadj, (N, N), jnp.float32)
    adj = (a + a.T) * 0.5
    adj = adj / jnp.sum(adj, axis=1, keepdims=True)

    params = (init_gc_params(k1, NFEAT, NHID), init_gc_params(k2, NHID, NCLASS))

    fwd = jax.jit(lambda x_, adj_: gcn_forward(x_, adj_, params))
    out = fwd(x, adj)
    out = jax.block_until_ready(out)
    assert out.shape == (N, NCLASS)

    # Reference check (bf16-matched math, same quantization as the kernel).
    (w1, b1), (w2, b2) = params
    ref_h = _ref_layer(x, w1, adj, b1, apply_relu=True)
    ref = _ref_layer(ref_h, w2, adj, b2, apply_relu=False)
    assert jnp.allclose(out, ref, atol=1e-2, rtol=1e-2), (
        float(jnp.max(jnp.abs(out - ref))))

    # Looser sanity check against the full-f32 reference (bf16 streaming error).
    ref_h32 = jnp.maximum(adj @ (x @ w1) + b1, 0.0)
    ref32 = adj @ (ref_h32 @ w2) + b2
    assert jnp.allclose(out, ref32, atol=5e-2, rtol=5e-2), (
        float(jnp.max(jnp.abs(out - ref32))))

    print("KERNEL_OK")
</pallas_src>

<mosaic_0001>
module attributes {stable_mosaic.version = 11 : i64} {
  func.func @_adj_matmul_kernel(%arg0: i32, %arg1: i32, %arg2: memref<128x128xbf16, #tpu.memory_space<vmem>>, %arg3: memref<128x128xbf16, #tpu.memory_space<vmem>>, %arg4: memref<1x128xf32, #tpu.memory_space<vmem>>, %arg5: memref<128x128xbf16, #tpu.memory_space<vmem>>, %arg6: memref<128x128xf32, #tpu.memory_space<vmem>>) attributes {dimension_semantics = [#tpu.dimension_semantics<parallel>, #tpu.dimension_semantics<arbitrary>], iteration_bounds = array<i64: 1, 1>, scalar_prefetch = 0 : i64, scratch_operands = 1 : i64, tpu.core_type = #tpu.core_type<tc>, window_params = [{transform_indices = @transform_0, window_bounds = array<i64: 128, 128>}, {transform_indices = @transform_1, window_bounds = array<i64: 128, 128>}, {pipeline_mode = #tpu.pipeline_mode<synchronous>, transform_indices = @transform_2, window_bounds = array<i64: 1, 128>}, {transform_indices = @transform_3, window_bounds = array<i64: 128, 128>}]} {
    %c0_i32 = arith.constant 0 : i32
    %0 = arith.cmpi eq, %arg1, %c0_i32 : i32
    %1 = arith.extui %0 : i1 to i32
    %c0_i32_0 = arith.constant 0 : i32
    %2 = arith.cmpi ne, %1, %c0_i32_0 : i32
    scf.if %2 {
      %c0_10 = arith.constant 0 : index
      %c0_11 = arith.constant 0 : index
      %12 = vector.load %arg4[%c0_10, %c0_11] : memref<1x128xf32, #tpu.memory_space<vmem>>, vector<1x128xf32>
      %13 = vector.shape_cast %12 : vector<1x128xf32> to vector<1x128xf32>
      %14 = vector.broadcast %13 : vector<1x128xf32> to vector<128x128xf32>
      %c0_12 = arith.constant 0 : index
      %c0_13 = arith.constant 0 : index
      %15 = vector.load %arg6[%c0_12, %c0_13] : memref<128x128xf32, #tpu.memory_space<vmem>>, vector<128x128xf32>
      tpu.vector_store %arg6[%c0_12, %c0_13], %14 {strides = array<i32>} : memref<128x128xf32, #tpu.memory_space<vmem>>, vector<128x128xf32>,
    } else {
    }
    %c0 = arith.constant 0 : index
    %c0_1 = arith.constant 0 : index
    %3 = vector.load %arg6[%c0, %c0_1] : memref<128x128xf32, #tpu.memory_space<vmem>>, vector<128x128xf32>
    %c0_2 = arith.constant 0 : index
    %c0_3 = arith.constant 0 : index
    %4 = vector.load %arg3[%c0_2, %c0_3] : memref<128x128xbf16, #tpu.memory_space<vmem>>, vector<128x128xbf16>
    %c0_4 = arith.constant 0 : index
    %c0_5 = arith.constant 0 : index
    %5 = vector.load %arg2[%c0_4, %c0_5] : memref<128x128xbf16, #tpu.memory_space<vmem>>, vector<128x128xbf16>
    %cst = arith.constant dense<0.000000e+00> : vector<128x128xf32>
    %6 = tpu.matmul %4, %5, %cst {dimension_numbers = #tpu.dot_dimension_numbers<[1], [0], [0], [1], [0, 0, 1, 1], [], []>} : vector<128x128xbf16>, vector<128x128xbf16>, vector<128x128xf32> -> vector<128x128xf32>
    %7 = arith.addf %3, %6 : vector<128x128xf32>
    %c0_6 = arith.constant 0 : index
    %c0_7 = arith.constant 0 : index
    %8 = vector.load %arg6[%c0_6, %c0_7] : memref<128x128xf32, #tpu.memory_space<vmem>>, vector<128x128xf32>
    tpu.vector_store %arg6[%c0_6, %c0_7], %7 {strides = array<i32>} : memref<128x128xf32, #tpu.memory_space<vmem>>, vector<128x128xf32>,
    %c0_i32_8 = arith.constant 0 : i32
    %9 = arith.cmpi eq, %arg1, %c0_i32_8 : i32
    %10 = arith.extui %9 : i1 to i32
    %c0_i32_9 = arith.constant 0 : i32
    %11 = arith.cmpi ne, %10, %c0_i32_9 : i32
    scf.if %11 {
      %c0_10 = arith.constant 0 : index
      %c0_11 = arith.constant 0 : index
      %12 = vector.load %arg6[%c0_10, %c0_11] : memref<128x128xf32, #tpu.memory_space<vmem>>, vector<128x128xf32>
      %cst_12 = arith.constant 0.000000e+00 : f32
      %13 = vector.broadcast %cst_12 : f32 to vector<128x128xf32>
      %14 = arith.maximumf %12, %13 : vector<128x128xf32>
      %15 = arith.truncf %14 : vector<128x128xf32> to vector<128x128xbf16>
      %c0_13 = arith.constant 0 : index
      %c0_14 = arith.constant 0 : index
      %16 = vector.load %arg5[%c0_13, %c0_14] : memref<128x128xbf16, #tpu.memory_space<vmem>>, vector<128x128xbf16>
      tpu.vector_store %arg5[%c0_13, %c0_14], %15 {strides = array<i32>} : memref<128x128xbf16, #tpu.memory_space<vmem>>, vector<128x128xbf16>,
    } else {
    }
    return
  }
  func.func @transform_0(%arg0: i32, %arg1: i32) -> (i32, i32) {
    %c0_i32 = arith.constant 0 : i32
    %c0_i32_0 = arith.constant 0 : i32
    return %arg1, %c0_i32 : i32, i32
  }
  func.func @transform_1(%arg0: i32, %arg1: i32) -> (i32, i32) {
    %c0_i32 = arith.constant 0 : i32
    return %arg0, %arg1 : i32, i32
  }
  func.func @transform_2(%arg0: i32, %arg1: i32) -> (i32, i32) {
    %c0_i32 = arith.constant 0 : i32
    %c0_i32_0 = arith.constant 0 : i32
    %c0_i32_1 = arith.constant 0 : i32
    return %c0_i32, %c0_i32_0 : i32, i32
  }
  func.func @transform_3(%arg0: i32, %arg1: i32) -> (i32, i32) {
    %c0_i32 = arith.constant 0 : i32
    %c0_i32_0 = arith.constant 0 : i32
    return %arg0, %c0_i32 : i32, i32
  }
}

module attributes {stable_mosaic.version = 11 : i64} {
  func.func @_adj_matmul_kernel(%arg0: i32, %arg1: i32, %arg2: memref<128x128xbf16, #tpu.memory_space<vmem>>, %arg3: memref<128x128xbf16, #tpu.memory_space<vmem>>, %arg4: memref<1x128xf32, #tpu.memory_space<vmem>>, %arg5: memref<128x128xf32, #tpu.memory_space<vmem>>) attributes {dimension_semantics = [#tpu.dimension_semantics<parallel>, #tpu.dimension_semantics<arbitrary>], iteration_bounds = array<i64: 1, 1>, scalar_prefetch = 0 : i64, scratch_operands = 0 : i64, tpu.core_type = #tpu.core_type<tc>, window_params = [{transform_indices = @transform_0, window_bounds = array<i64: 128, 128>}, {transform_indices = @transform_1, window_bounds = array<i64: 128, 128>}, {pipeline_mode = #tpu.pipeline_mode<synchronous>, transform_indices = @transform_2, window_bounds = array<i64: 1, 128>}, {transform_indices = @transform_3, window_bounds = array<i64: 128, 128>}]} {
    %c0_i32 = arith.constant 0 : i32
    %0 = arith.cmpi eq, %arg1, %c0_i32 : i32
    %1 = arith.extui %0 : i1 to i32
    %c0_i32_0 = arith.constant 0 : i32
    %2 = arith.cmpi ne, %1, %c0_i32_0 : i32
    scf.if %2 {
      %c0_8 = arith.constant 0 : index
      %c0_9 = arith.constant 0 : index
      %9 = vector.load %arg4[%c0_8, %c0_9] : memref<1x128xf32, #tpu.memory_space<vmem>>, vector<1x128xf32>
      %10 = vector.shape_cast %9 : vector<1x128xf32> to vector<1x128xf32>
      %11 = vector.broadcast %10 : vector<1x128xf32> to vector<128x128xf32>
      %c0_10 = arith.constant 0 : index
      %c0_11 = arith.constant 0 : index
      %12 = vector.load %arg5[%c0_10, %c0_11] : memref<128x128xf32, #tpu.memory_space<vmem>>, vector<128x128xf32>
      tpu.vector_store %arg5[%c0_10, %c0_11], %11 {strides = array<i32>} : memref<128x128xf32, #tpu.memory_space<vmem>>, vector<128x128xf32>,
    } else {
    }
    %c0 = arith.constant 0 : index
    %c0_1 = arith.constant 0 : index
    %3 = vector.load %arg5[%c0, %c0_1] : memref<128x128xf32, #tpu.memory_space<vmem>>, vector<128x128xf32>
    %c0_2 = arith.constant 0 : index
    %c0_3 = arith.constant 0 : index
    %4 = vector.load %arg3[%c0_2, %c0_3] : memref<128x128xbf16, #tpu.memory_space<vmem>>, vector<128x128xbf16>
    %c0_4 = arith.constant 0 : index
    %c0_5 = arith.constant 0 : index
    %5 = vector.load %arg2[%c0_4, %c0_5] : memref<128x128xbf16, #tpu.memory_space<vmem>>, vector<128x128xbf16>
    %cst = arith.constant dense<0.000000e+00> : vector<128x128xf32>
    %6 = tpu.matmul %4, %5, %cst {dimension_numbers = #tpu.dot_dimension_numbers<[1], [0], [0], [1], [0, 0, 1, 1], [], []>} : vector<128x128xbf16>, vector<128x128xbf16>, vector<128x128xf32> -> vector<128x128xf32>
    %7 = arith.addf %3, %6 : vector<128x128xf32>
    %c0_6 = arith.constant 0 : index
    %c0_7 = arith.constant 0 : index
    %8 = vector.load %arg5[%c0_6, %c0_7] : memref<128x128xf32, #tpu.memory_space<vmem>>, vector<128x128xf32>
    tpu.vector_store %arg5[%c0_6, %c0_7], %7 {strides = array<i32>} : memref<128x128xf32, #tpu.memory_space<vmem>>, vector<128x128xf32>,
    return
  }
  func.func @transform_0(%arg0: i32, %arg1: i32) -> (i32, i32) {
    %c0_i32 = arith.constant 0 : i32
    %c0_i32_0 = arith.constant 0 : i32
    return %arg1, %c0_i32 : i32, i32
  }
  func.func @transform_1(%arg0: i32, %arg1: i32) -> (i32, i32) {
    %c0_i32 = arith.constant 0 : i32
    return %arg0, %arg1 : i32, i32
  }
  func.func @transform_2(%arg0: i32, %arg1: i32) -> (i32, i32) {
    %c0_i32 = arith.constant 0 : i32
    %c0_i32_0 = arith.constant 0 : i32
    %c0_i32_1 = arith.constant 0 : i32
    return %c0_i32, %c0_i32_0 : i32, i32
  }
  func.func @transform_3(%arg0: i32, %arg1: i32) -> (i32, i32) {
    %c0_i32 = arith.constant 0 : i32
    %c0_i32_0 = arith.constant 0 : i32
    return %arg0, %c0_i32 : i32, i32
  }
}

module attributes {stable_mosaic.version = 11 : i64} {
  func.func @_support_kernel(%arg0: i32, %arg1: memref<128x128xbf16, #tpu.memory_space<vmem>>, %arg2: memref<128x128xbf16, #tpu.memory_space<vmem>>, %arg3: memref<128x128xbf16, #tpu.memory_space<vmem>>) attributes {dimension_semantics = [#tpu.dimension_semantics<parallel>], iteration_bounds = array<i64: 1>, scalar_prefetch = 0 : i64, scratch_operands = 0 : i64, tpu.core_type = #tpu.core_type<tc>, window_params = [{transform_indices = @transform_0, window_bounds = array<i64: 128, 128>}, {pipeline_mode = #tpu.pipeline_mode<synchronous>, transform_indices = @transform_1, window_bounds = array<i64: 128, 128>}, {transform_indices = @transform_2, window_bounds = array<i64: 128, 128>}]} {
    %c0 = arith.constant 0 : index
    %c0_0 = arith.constant 0 : index
    %0 = vector.load %arg1[%c0, %c0_0] : memref<128x128xbf16, #tpu.memory_space<vmem>>, vector<128x128xbf16>
    %c0_1 = arith.constant 0 : index
    %c0_2 = arith.constant 0 : index
    %1 = vector.load %arg2[%c0_1, %c0_2] : memref<128x128xbf16, #tpu.memory_space<vmem>>, vector<128x128xbf16>
    %cst = arith.constant dense<0.000000e+00> : vector<128x128xf32>
    %2 = tpu.matmul %0, %1, %cst {dimension_numbers = #tpu.dot_dimension_numbers<[1], [0], [0], [1], [0, 0, 1, 1], [], []>} : vector<128x128xbf16>, vector<128x128xbf16>, vector<128x128xf32> -> vector<128x128xf32>
    %3 = arith.truncf %2 : vector<128x128xf32> to vector<128x128xbf16>
    %c0_3 = arith.constant 0 : index
    %c0_4 = arith.constant 0 : index
    %4 = vector.load %arg3[%c0_3, %c0_4] : memref<128x128xbf16, #tpu.memory_space<vmem>>, vector<128x128xbf16>
    tpu.vector_store %arg3[%c0_3, %c0_4], %3 {strides = array<i32>} : memref<128x128xbf16, #tpu.memory_space<vmem>>, vector<128x128xbf16>,
    return
  }
  func.func @transform_0(%arg0: i32) -> (i32, i32) {
    %c0_i32 = arith.constant 0 : i32
    %c0_i32_0 = arith.constant 0 : i32
    return %arg0, %c0_i32 : i32, i32
  }
  func.func @transform_1(%arg0: i32) -> (i32, i32) {
    %c0_i32 = arith.constant 0 : i32
    %c0_i32_0 = arith.constant 0 : i32
    %c0_i32_1 = arith.constant 0 : i32
    return %c0_i32, %c0_i32_0 : i32, i32
  }
  func.func @transform_2(%arg0: i32) -> (i32, i32) {
    %c0_i32 = arith.constant 0 : i32
    %c0_i32_0 = arith.constant 0 : i32
    return %arg0, %c0_i32 : i32, i32
  }
}

</mosaic_0001>

<bundles_post_ra>
// kernel: _lambda_.4
= control target key start
LH: loop header
LB: loop body
LE: loop exit
PB: predicated region body
PF: predicated region fallthrough
CT: control target
= control target key end

     0   :  { %s462_s1 = inlined_call_operand.vmem [shape: bf16[128,128], index: 1, kind: input, shape index: {}]   ;;  %s463_s0 = inlined_call_operand.vmem [shape: bf16[128,128], index: 0, kind: input, shape index: {}]   ;;  %s464_s2 = inlined_call_operand.vmem [shape: bf16[128,128], index: 2, kind: output, shape index: {}]  }
   0x1   :  { %v303_v0 = vld [vmem:[%s462_s1 + $0x38] sm:$0xff]  ;;  %v302_v1 = vld [vmem:[%s462_s1 + $0x30] sm:$0xff]  ;;  %v301_v2 = vld [vmem:[%s462_s1 + $0x28] sm:$0xff] }
   0x2   :  { %139 = vmatpush.bf16.msra.mxu0 %v303_v0  ;;  %351 = vmatpush.bf16.msra.mxu1 %v303_v0  ;;  %v300_v3 = vld [vmem:[%s462_s1 + $0x20] sm:$0xff]  ;;  %v299_v4 = vld [vmem:[%s462_s1 + $0x18] sm:$0xff]  ;;  %v298_v5 = vld [vmem:[%s462_s1 + $0x10] sm:$0xff] }
   0x3   :  { %352 = vmatpush.bf16.msra.mxu2 %v303_v0  ;;  %353 = vmatpush.bf16.msra.mxu3 %v303_v0  ;;  %v297_v6 = vld [vmem:[%s462_s1 + $0x8] sm:$0xff]  ;;  %v296_v7 = vld [vmem:[%s462_s1] sm:$0xff]  ;;  %v290_v9 = vld [vmem:[%s463_s0 + $0x10] sm:$0xff] }
   0x4   :  { %v288_v8 = vld [vmem:[%s463_s0] sm:$0xff]  ;;  %v294_v11 = vld [vmem:[%s463_s0 + $0x30] sm:$0xff]  ;;  %v289_v12 = vld [vmem:[%s463_s0 + $0x8] sm:$0xff] }
   0x5   :  { %v292_v10 = vld [vmem:[%s463_s0 + $0x20] sm:$0xff]  ;;  %v291_v13 = vld [vmem:[%s463_s0 + $0x18] sm:$0xff]  ;;  %v293_v14 = vld [vmem:[%s463_s0 + $0x28] sm:$0xff] }
   0x6   :  { %140 = vmatpush.bf16.msra.mxu0 %v302_v1  ;;  %354 = vmatpush.bf16.msra.mxu1 %v302_v1  ;;  %v295_v15 = vld [vmem:[%s463_s0 + $0x38] sm:$0xff] }
   0x7   :  { %355 = vmatpush.bf16.msra.mxu2 %v302_v1  ;;  %356 = vmatpush.bf16.msra.mxu3 %v302_v1 }
   0xa   :  { %141 = vmatpush.bf16.msra.mxu0 %v301_v2  ;;  %357 = vmatpush.bf16.msra.mxu1 %v301_v2 }
   0xb   :  { %358 = vmatpush.bf16.msra.mxu2 %v301_v2  ;;  %359 = vmatpush.bf16.msra.mxu3 %v301_v2 }
   0xe   :  { %142 = vmatpush.bf16.msra.mxu0 %v300_v3  ;;  %360 = vmatpush.bf16.msra.mxu1 %v300_v3 }
   0xf   :  { %361 = vmatpush.bf16.msra.mxu2 %v300_v3  ;;  %362 = vmatpush.bf16.msra.mxu3 %v300_v3 }
  0x12   :  { %143 = vmatpush.bf16.msra.mxu0 %v299_v4  ;;  %363 = vmatpush.bf16.msra.mxu1 %v299_v4 }
  0x13   :  { %364 = vmatpush.bf16.msra.mxu2 %v299_v4  ;;  %365 = vmatpush.bf16.msra.mxu3 %v299_v4 }
  0x16   :  { %144 = vmatpush.bf16.msra.mxu0 %v298_v5  ;;  %366 = vmatpush.bf16.msra.mxu1 %v298_v5 }
  0x17   :  { %367 = vmatpush.bf16.msra.mxu2 %v298_v5  ;;  %368 = vmatpush.bf16.msra.mxu3 %v298_v5 }
  0x1a   :  { %145 = vmatpush.bf16.msra.mxu0 %v297_v6  ;;  %369 = vmatpush.bf16.msra.mxu1 %v297_v6 }
  0x1b   :  { %370 = vmatpush.bf16.msra.mxu2 %v297_v6  ;;  %371 = vmatpush.bf16.msra.mxu3 %v297_v6 }
  0x1e   :  { %146 = vmatpush.bf16.msra.mxu0 %v296_v7  ;;  %372 = vmatpush.bf16.msra.mxu1 %v296_v7 }
  0x1f   :  { %373 = vmatpush.bf16.msra.mxu2 %v296_v7  ;;  %374 = vmatpush.bf16.msra.mxu3 %v296_v7 }
  0x21   :  { %147 = vmatmul.bf16.vlgmr.msra.gmra.mxu0 %v288_v8  ;;  %157 = vmatmul.bf16.vlgmr.msra.gmra.mxu1 %v290_v9 }
  0x22   :  { %167 = vmatmul.bf16.vlgmr.msra.gmra.mxu2 %v292_v10  ;;  %177 = vmatmul.bf16.vlgmr.msra.gmra.mxu3 %v294_v11 }
  0x31   :  { %152 = vmatmul.bf16.gmra.mxu0 %v289_v12  ;;  %162 = vmatmul.bf16.gmra.mxu1 %v291_v13 }
  0x32   :  { %172 = vmatmul.bf16.gmra.mxu2 %v293_v14  ;;  %182 = vmatmul.bf16.gmra.mxu3 %v295_v15 }
  0x9e   :  { %v148_v16 = vpop.f32.mrf.mxu0  ;;  %v158_v17 = vpop.f32.mrf.mxu1 }
  0xa5   :  { %v168_v18 = vpop.f32.mrf.mxu2  ;;  %v178_v19 = vpop.f32.mrf.mxu3 }
  0xa6   :  { %v150_v20 = vpop.f32.mrf.mxu0  ;;  %v160_v21 = vpop.f32.mrf.mxu1 }
  0xa7   :  { %v307_v22 = vpack.c.bf16 %v150_v20, %v148_v16  ;;  %v317_v23 = vpack.c.bf16 %v160_v21, %v158_v17 }
  0xa9   :  { %308 = vst [vmem:[%s464_s2] sm:$0xff] %v307_v22  }
  0xaa   :  { %345 = vst [vmem:[%s464_s2 + $0x10] sm:$0xff] %v317_v23  }
  0xad   :  { %v170_v24 = vpop.f32.mrf.mxu2  ;;  %v180_v25 = vpop.f32.mrf.mxu3 }
  0xae   :  { %v327_v26 = vpack.c.bf16 %v170_v24, %v168_v18  ;;  %v337_v27 = vpack.c.bf16 %v180_v25, %v178_v19  ;;  %v153_v28 = vpop.f32.mrf.mxu0  ;;  %v163_v29 = vpop.f32.mrf.mxu1 }
  0xb0   :  { %347 = vst [vmem:[%s464_s2 + $0x20] sm:$0xff] %v327_v26  }
  0xb1   :  { %349 = vst [vmem:[%s464_s2 + $0x30] sm:$0xff] %v337_v27  }
  0xb5   :  { %v173_v30 = vpop.f32.mrf.mxu2  ;;  %v183_v31 = vpop.f32.mrf.mxu3 }
  0xb6   :  { %v155_v32 = vpop.f32.mrf.mxu0  ;;  %v165_v33 = vpop.f32.mrf.mxu1 }
  0xb7   :  { %v312_v34 = vpack.c.bf16 %v155_v32, %v153_v28  ;;  %v322_v35 = vpack.c.bf16 %v165_v33, %v163_v29 }
  0xb9   :  { %344 = vst [vmem:[%s464_s2 + $0x8] sm:$0xff] %v312_v34  }
  0xba   :  { %346 = vst [vmem:[%s464_s2 + $0x18] sm:$0xff] %v322_v35  }
  0xbd   :  { %v175_v36 = vpop.f32.mrf.mxu2  ;;  %v185_v37 = vpop.f32.mrf.mxu3 }
  0xbe   :  { %v332_v38 = vpack.c.bf16 %v175_v36, %v173_v30  ;;  %v342_v39 = vpack.c.bf16 %v185_v37, %v183_v31 }
  0xc0   :  { %348 = vst [vmem:[%s464_s2 + $0x28] sm:$0xff] %v332_v38  }
  0xc1   :  { %350 = vst [vmem:[%s464_s2 + $0x38] sm:$0xff] %v342_v39  }

// kernel: _lambda_.7
= control target key start
LH: loop header
LB: loop body
LE: loop exit
PB: predicated region body
PF: predicated region fallthrough
CT: control target
= control target key end

     0   :  { %s491_s0 = inlined_call_operand.vmem [shape: bf16[128,128], index: 0, kind: input, shape index: {}]   ;;  %s492_s2 = inlined_call_operand.vmem [shape: f32[1,128], index: 2, kind: input, shape index: {}]   ;;  %s493_s1 = inlined_call_operand.vmem [shape: bf16[128,128], index: 1, kind: input, shape index: {}]   ;;  %s494_s3 = inlined_call_operand.vmem [shape: f32[128,128], index: 3, kind: output, shape index: {}]  }
   0x1   :  { %v346_v0 = vld [vmem:[%s491_s0 + $0x38] sm:$0xff]  ;;  %v345_v1 = vld [vmem:[%s491_s0 + $0x30] sm:$0xff]  ;;  %v344_v2 = vld [vmem:[%s491_s0 + $0x28] sm:$0xff] }
   0x2   :  { %182 = vmatpush.bf16.msra.mxu0 %v346_v0  ;;  %347 = vmatpush.bf16.msra.mxu1 %v346_v0  ;;  %v343_v3 = vld [vmem:[%s491_s0 + $0x20] sm:$0xff]  ;;  %v342_v4 = vld [vmem:[%s491_s0 + $0x18] sm:$0xff]  ;;  %v341_v5 = vld [vmem:[%s491_s0 + $0x10] sm:$0xff] }
   0x3   :  { %348 = vmatpush.bf16.msra.mxu2 %v346_v0  ;;  %349 = vmatpush.bf16.msra.mxu3 %v346_v0  ;;  %v340_v6 = vld [vmem:[%s491_s0 + $0x8] sm:$0xff]  ;;  %v339_v7 = vld [vmem:[%s491_s0] sm:$0xff]  ;;  %v333_v9 = vld [vmem:[%s493_s1 + $0x10] sm:$0xff] }
   0x4   :  { %v331_v8 = vld [vmem:[%s493_s1] sm:$0xff]  ;;  %v337_v11 = vld [vmem:[%s493_s1 + $0x30] sm:$0xff]  ;;  %v332_v12 = vld [vmem:[%s493_s1 + $0x8] sm:$0xff] }
   0x5   :  { %v335_v10 = vld [vmem:[%s493_s1 + $0x20] sm:$0xff]  ;;  %v334_v13 = vld [vmem:[%s493_s1 + $0x18] sm:$0xff]  ;;  %v336_v14 = vld [vmem:[%s493_s1 + $0x28] sm:$0xff] }
   0x6   :  { %183 = vmatpush.bf16.msra.mxu0 %v345_v1  ;;  %350 = vmatpush.bf16.msra.mxu1 %v345_v1  ;;  %v338_v15 = vld [vmem:[%s493_s1 + $0x38] sm:$0xff]  ;;  %v371_v16 = vld [vmem:[%s492_s2] ss:$0 sm:$0xff] }
   0x7   :  { %351 = vmatpush.bf16.msra.mxu2 %v345_v1  ;;  %352 = vmatpush.bf16.msra.mxu3 %v345_v1 }
   0xa   :  { %184 = vmatpush.bf16.msra.mxu0 %v344_v2  ;;  %353 = vmatpush.bf16.msra.mxu1 %v344_v2 }
   0xb   :  { %354 = vmatpush.bf16.msra.mxu2 %v344_v2  ;;  %355 = vmatpush.bf16.msra.mxu3 %v344_v2 }
   0xe   :  { %185 = vmatpush.bf16.msra.mxu0 %v343_v3  ;;  %356 = vmatpush.bf16.msra.mxu1 %v343_v3 }
   0xf   :  { %357 = vmatpush.bf16.msra.mxu2 %v343_v3  ;;  %358 = vmatpush.bf16.msra.mxu3 %v343_v3 }
  0x12   :  { %186 = vmatpush.bf16.msra.mxu0 %v342_v4  ;;  %359 = vmatpush.bf16.msra.mxu1 %v342_v4 }
  0x13   :  { %360 = vmatpush.bf16.msra.mxu2 %v342_v4  ;;  %361 = vmatpush.bf16.msra.mxu3 %v342_v4 }
  0x16   :  { %187 = vmatpush.bf16.msra.mxu0 %v341_v5  ;;  %362 = vmatpush.bf16.msra.mxu1 %v341_v5 }
  0x17   :  { %363 = vmatpush.bf16.msra.mxu2 %v341_v5  ;;  %364 = vmatpush.bf16.msra.mxu3 %v341_v5 }
  0x1a   :  { %188 = vmatpush.bf16.msra.mxu0 %v340_v6  ;;  %365 = vmatpush.bf16.msra.mxu1 %v340_v6 }
  0x1b   :  { %366 = vmatpush.bf16.msra.mxu2 %v340_v6  ;;  %367 = vmatpush.bf16.msra.mxu3 %v340_v6 }
  0x1e   :  { %189 = vmatpush.bf16.msra.mxu0 %v339_v7  ;;  %368 = vmatpush.bf16.msra.mxu1 %v339_v7 }
  0x1f   :  { %369 = vmatpush.bf16.msra.mxu2 %v339_v7  ;;  %370 = vmatpush.bf16.msra.mxu3 %v339_v7 }
  0x21   :  { %190 = vmatmul.bf16.vlgmr.msra.gmra.mxu0 %v331_v8  ;;  %200 = vmatmul.bf16.vlgmr.msra.gmra.mxu1 %v333_v9 }
  0x22   :  { %210 = vmatmul.bf16.vlgmr.msra.gmra.mxu2 %v335_v10  ;;  %220 = vmatmul.bf16.vlgmr.msra.gmra.mxu3 %v337_v11 }
  0x31   :  { %195 = vmatmul.bf16.gmra.mxu0 %v332_v12  ;;  %205 = vmatmul.bf16.gmra.mxu1 %v334_v13 }
  0x32   :  { %215 = vmatmul.bf16.gmra.mxu2 %v336_v14  ;;  %225 = vmatmul.bf16.gmra.mxu3 %v338_v15 }
  0x9e   :  { %v191_v17 = vpop.f32.mrf.mxu0  ;;  %v201_v18 = vpop.f32.mrf.mxu1 }
  0x9f   :  { %v231_v19 = vadd.f32 %v371_v16, %v191_v17  ;;  %v235_v20 = vadd.f32 %v371_v16, %v201_v18 }
  0xa1   :  { %247 = vst [vmem:[%s494_s3] sm:$0xff] %v231_v19 }
  0xa2   :  { %251 = vst [vmem:[%s494_s3 + $0x20] sm:$0xff] %v235_v20 }
  0xa5   :  { %v211_v21 = vpop.f32.mrf.mxu2  ;;  %v221_v22 = vpop.f32.mrf.mxu3 }
  0xa6   :  { %v239_v23 = vadd.f32 %v371_v16, %v211_v21  ;;  %v243_v24 = vadd.f32 %v371_v16, %v221_v22  ;;  %v193_v25 = vpop.f32.mrf.mxu0  ;;  %v203_v26 = vpop.f32.mrf.mxu1 }
  0xa7   :  { %v232_v27 = vadd.f32 %v371_v16, %v193_v25  ;;  %v236_v28 = vadd.f32 %v371_v16, %v203_v26 }
  0xa8   :  { %255 = vst [vmem:[%s494_s3 + $0x40] sm:$0xff] %v239_v23 }
  0xa9   :  { %259 = vst [vmem:[%s494_s3 + $0x60] sm:$0xff] %v243_v24 }
  0xaa   :  { %248 = vst [vmem:[%s494_s3 + $0x8] sm:$0xff] %v232_v27 }
  0xab   :  { %252 = vst [vmem:[%s494_s3 + $0x28] sm:$0xff] %v236_v28 }
  0xad   :  { %v213_v29 = vpop.f32.mrf.mxu2  ;;  %v223_v30 = vpop.f32.mrf.mxu3 }
  0xae   :  { %v240_v31 = vadd.f32 %v371_v16, %v213_v29  ;;  %v244_v32 = vadd.f32 %v371_v16, %v223_v30  ;;  %v196_v33 = vpop.f32.mrf.mxu0  ;;  %v206_v34 = vpop.f32.mrf.mxu1 }
  0xaf   :  { %v233_v35 = vadd.f32 %v371_v16, %v196_v33  ;;  %v237_v36 = vadd.f32 %v371_v16, %v206_v34 }
  0xb0   :  { %256 = vst [vmem:[%s494_s3 + $0x48] sm:$0xff] %v240_v31 }
  0xb1   :  { %260 = vst [vmem:[%s494_s3 + $0x68] sm:$0xff] %v244_v32 }
  0xb2   :  { %249 = vst [vmem:[%s494_s3 + $0x10] sm:$0xff] %v233_v35 }
  0xb3   :  { %253 = vst [vmem:[%s494_s3 + $0x30] sm:$0xff] %v237_v36 }
  0xb5   :  { %v216_v37 = vpop.f32.mrf.mxu2  ;;  %v226_v38 = vpop.f32.mrf.mxu3 }
  0xb6   :  { %v241_v39 = vadd.f32 %v371_v16, %v216_v37  ;;  %v245_v40 = vadd.f32 %v371_v16, %v226_v38  ;;  %v198_v41 = vpop.f32.mrf.mxu0  ;;  %v208_v42 = vpop.f32.mrf.mxu1 }
  0xb7   :  { %v234_v43 = vadd.f32 %v371_v16, %v198_v41  ;;  %v238_v44 = vadd.f32 %v371_v16, %v208_v42 }
  0xb8   :  { %257 = vst [vmem:[%s494_s3 + $0x50] sm:$0xff] %v241_v39 }
  0xb9   :  { %261 = vst [vmem:[%s494_s3 + $0x70] sm:$0xff] %v245_v40 }
  0xba   :  { %250 = vst [vmem:[%s494_s3 + $0x18] sm:$0xff] %v234_v43 }
  0xbb   :  { %254 = vst [vmem:[%s494_s3 + $0x38] sm:$0xff] %v238_v44 }
  0xbd   :  { %v218_v45 = vpop.f32.mrf.mxu2  ;;  %v228_v46 = vpop.f32.mrf.mxu3 }
  0xbe   :  { %v242_v47 = vadd.f32 %v371_v16, %v218_v45  ;;  %v246_v48 = vadd.f32 %v371_v16, %v228_v46 }
  0xc0   :  { %258 = vst [vmem:[%s494_s3 + $0x58] sm:$0xff] %v242_v47 }
  0xc1   :  { %262 = vst [vmem:[%s494_s3 + $0x78] sm:$0xff] %v246_v48 }

// kernel: _lambda_.5
= control target key start
LH: loop header
LB: loop body
LE: loop exit
PB: predicated region body
PF: predicated region fallthrough
CT: control target
= control target key end

     0   :  { %s581_s0 = inlined_call_operand.vmem [shape: bf16[128,128], index: 0, kind: input, shape index: {}]   ;;  %s582_s2 = inlined_call_operand.vmem [shape: f32[1,128], index: 2, kind: input, shape index: {}]   ;;  %s583_s1 = inlined_call_operand.vmem [shape: bf16[128,128], index: 1, kind: input, shape index: {}]   ;;  %s584_s3 = inlined_call_operand.vmem [shape: bf16[128,128], index: 3, kind: output, shape index: {}]  }
   0x1   :  { %v413_v0 = vld [vmem:[%s581_s0 + $0x38] sm:$0xff]  ;;  %v412_v1 = vld [vmem:[%s581_s0 + $0x30] sm:$0xff]  ;;  %v411_v2 = vld [vmem:[%s581_s0 + $0x28] sm:$0xff] }
   0x2   :  { %182 = vmatpush.bf16.msra.mxu0 %v413_v0  ;;  %461 = vmatpush.bf16.msra.mxu1 %v413_v0  ;;  %v410_v3 = vld [vmem:[%s581_s0 + $0x20] sm:$0xff]  ;;  %v409_v4 = vld [vmem:[%s581_s0 + $0x18] sm:$0xff]  ;;  %v408_v5 = vld [vmem:[%s581_s0 + $0x10] sm:$0xff] }
   0x3   :  { %462 = vmatpush.bf16.msra.mxu2 %v413_v0  ;;  %463 = vmatpush.bf16.msra.mxu3 %v413_v0  ;;  %v407_v6 = vld [vmem:[%s581_s0 + $0x8] sm:$0xff]  ;;  %v406_v7 = vld [vmem:[%s581_s0] sm:$0xff]  ;;  %v400_v9 = vld [vmem:[%s583_s1 + $0x10] sm:$0xff] }
   0x4   :  { %v398_v8 = vld [vmem:[%s583_s1] sm:$0xff]  ;;  %v404_v11 = vld [vmem:[%s583_s1 + $0x30] sm:$0xff]  ;;  %v399_v12 = vld [vmem:[%s583_s1 + $0x8] sm:$0xff] }
   0x5   :  { %v402_v10 = vld [vmem:[%s583_s1 + $0x20] sm:$0xff]  ;;  %v401_v13 = vld [vmem:[%s583_s1 + $0x18] sm:$0xff]  ;;  %v403_v14 = vld [vmem:[%s583_s1 + $0x28] sm:$0xff] }
   0x6   :  { %183 = vmatpush.bf16.msra.mxu0 %v412_v1  ;;  %464 = vmatpush.bf16.msra.mxu1 %v412_v1  ;;  %v405_v15 = vld [vmem:[%s583_s1 + $0x38] sm:$0xff]  ;;  %v485_v18 = vld [vmem:[%s582_s2] ss:$0 sm:$0xff] }
   0x7   :  { %465 = vmatpush.bf16.msra.mxu2 %v412_v1  ;;  %466 = vmatpush.bf16.msra.mxu3 %v412_v1 }
   0xa   :  { %184 = vmatpush.bf16.msra.mxu0 %v411_v2  ;;  %467 = vmatpush.bf16.msra.mxu1 %v411_v2 }
   0xb   :  { %468 = vmatpush.bf16.msra.mxu2 %v411_v2  ;;  %469 = vmatpush.bf16.msra.mxu3 %v411_v2 }
   0xe   :  { %185 = vmatpush.bf16.msra.mxu0 %v410_v3  ;;  %470 = vmatpush.bf16.msra.mxu1 %v410_v3 }
   0xf   :  { %471 = vmatpush.bf16.msra.mxu2 %v410_v3  ;;  %472 = vmatpush.bf16.msra.mxu3 %v410_v3 }
  0x12   :  { %186 = vmatpush.bf16.msra.mxu0 %v409_v4  ;;  %473 = vmatpush.bf16.msra.mxu1 %v409_v4 }
  0x13   :  { %474 = vmatpush.bf16.msra.mxu2 %v409_v4  ;;  %475 = vmatpush.bf16.msra.mxu3 %v409_v4 }
  0x16   :  { %187 = vmatpush.bf16.msra.mxu0 %v408_v5  ;;  %476 = vmatpush.bf16.msra.mxu1 %v408_v5 }
  0x17   :  { %477 = vmatpush.bf16.msra.mxu2 %v408_v5  ;;  %478 = vmatpush.bf16.msra.mxu3 %v408_v5 }
  0x1a   :  { %188 = vmatpush.bf16.msra.mxu0 %v407_v6  ;;  %479 = vmatpush.bf16.msra.mxu1 %v407_v6 }
  0x1b   :  { %480 = vmatpush.bf16.msra.mxu2 %v407_v6  ;;  %481 = vmatpush.bf16.msra.mxu3 %v407_v6 }
  0x1e   :  { %189 = vmatpush.bf16.msra.mxu0 %v406_v7  ;;  %482 = vmatpush.bf16.msra.mxu1 %v406_v7 }
  0x1f   :  { %483 = vmatpush.bf16.msra.mxu2 %v406_v7  ;;  %484 = vmatpush.bf16.msra.mxu3 %v406_v7 }
  0x21   :  { %190 = vmatmul.bf16.vlgmr.msra.gmra.mxu0 %v398_v8  ;;  %200 = vmatmul.bf16.vlgmr.msra.gmra.mxu1 %v400_v9 }
  0x22   :  { %210 = vmatmul.bf16.vlgmr.msra.gmra.mxu2 %v402_v10  ;;  %220 = vmatmul.bf16.vlgmr.msra.gmra.mxu3 %v404_v11 }
  0x31   :  { %195 = vmatmul.bf16.gmra.mxu0 %v399_v12  ;;  %205 = vmatmul.bf16.gmra.mxu1 %v401_v13 }
  0x32   :  { %215 = vmatmul.bf16.gmra.mxu2 %v403_v14  ;;  %225 = vmatmul.bf16.gmra.mxu3 %v405_v15 }
  0x9e   :  { %v191_v16 = vpop.f32.mrf.mxu0  ;;  %v201_v17 = vpop.f32.mrf.mxu1 }
  0x9f   :  { %v231_v19 = vadd.f32 %v485_v18, %v191_v16  ;;  %v235_v20 = vadd.f32 %v485_v18, %v201_v17 }
  0xa1   :  { %v282_v27 = vmax.f32 %v231_v19, 0.0  ;;  %v286_v28 = vmax.f32 %v235_v20, 0.0 }
  0xa5   :  { %v211_v21 = vpop.f32.mrf.mxu2  ;;  %v221_v22 = vpop.f32.mrf.mxu3 }
  0xa6   :  { %v193_v23 = vpop.f32.mrf.mxu0  ;;  %v203_v24 = vpop.f32.mrf.mxu1  ;;  %v239_v33 = vadd.f32 %v485_v18, %v211_v21  ;;  %v243_v34 = vadd.f32 %v485_v18, %v221_v22 }
  0xa7   :  { %v232_v25 = vadd.f32 %v485_v18, %v193_v23  ;;  %v236_v26 = vadd.f32 %v485_v18, %v203_v24 }
  0xa8   :  { %v290_v41 = vmax.f32 %v239_v33, 0.0  ;;  %v294_v42 = vmax.f32 %v243_v34, 0.0 }
  0xa9   :  { %v283_v29 = vmax.f32 %v232_v25, 0.0  ;;  %v287_v30 = vmax.f32 %v236_v26, 0.0 }
  0xab   :  { %v417_v31 = vpack.c.bf16 %v283_v29, %v282_v27  ;;  %v427_v32 = vpack.c.bf16 %v287_v30, %v286_v28 }
  0xad   :  { %418 = vst [vmem:[%s584_s3] sm:$0xff] %v417_v31   ;;  %v213_v35 = vpop.f32.mrf.mxu2  ;;  %v223_v36 = vpop.f32.mrf.mxu3 }
  0xae   :  { %455 = vst [vmem:[%s584_s3 + $0x10] sm:$0xff] %v427_v32   ;;  %v240_v37 = vadd.f32 %v485_v18, %v213_v35  ;;  %v244_v38 = vadd.f32 %v485_v18, %v223_v36  ;;  %v196_v39 = vpop.f32.mrf.mxu0  ;;  %v206_v40 = vpop.f32.mrf.mxu1 }
  0xaf   :  { %v233_v47 = vadd.f32 %v485_v18, %v196_v39  ;;  %v237_v48 = vadd.f32 %v485_v18, %v206_v40 }
  0xb0   :  { %v291_v43 = vmax.f32 %v240_v37, 0.0  ;;  %v295_v44 = vmax.f32 %v244_v38, 0.0 }
  0xb1   :  { %v284_v55 = vmax.f32 %v233_v47, 0.0  ;;  %v288_v56 = vmax.f32 %v237_v48, 0.0 }
  0xb2   :  { %v437_v45 = vpack.c.bf16 %v291_v43, %v290_v41  ;;  %v447_v46 = vpack.c.bf16 %v295_v44, %v294_v42 }
  0xb4   :  { %457 = vst [vmem:[%s584_s3 + $0x20] sm:$0xff] %v437_v45  }
  0xb5   :  { %459 = vst [vmem:[%s584_s3 + $0x30] sm:$0xff] %v447_v46   ;;  %v216_v49 = vpop.f32.mrf.mxu2  ;;  %v226_v50 = vpop.f32.mrf.mxu3 }
  0xb6   :  { %v198_v51 = vpop.f32.mrf.mxu0  ;;  %v208_v52 = vpop.f32.mrf.mxu1  ;;  %v241_v61 = vadd.f32 %v485_v18, %v216_v49  ;;  %v245_v62 = vadd.f32 %v485_v18, %v226_v50 }
  0xb7   :  { %v234_v53 = vadd.f32 %v485_v18, %v198_v51  ;;  %v238_v54 = vadd.f32 %v485_v18, %v208_v52 }
  0xb8   :  { %v292_v3 = vmax.f32 %v241_v61, 0.0  ;;  %v296_v4 = vmax.f32 %v245_v62, 0.0 }
  0xb9   :  { %v285_v57 = vmax.f32 %v234_v53, 0.0  ;;  %v289_v58 = vmax.f32 %v238_v54, 0.0 }
  0xbb   :  { %v422_v59 = vpack.c.bf16 %v285_v57, %v284_v55  ;;  %v432_v60 = vpack.c.bf16 %v289_v58, %v288_v56 }
  0xbd   :  { %454 = vst [vmem:[%s584_s3 + $0x8] sm:$0xff] %v422_v59   ;;  %v218_v63 = vpop.f32.mrf.mxu2  ;;  %v228_v0 = vpop.f32.mrf.mxu3 }
  0xbe   :  { %456 = vst [vmem:[%s584_s3 + $0x18] sm:$0xff] %v432_v60   ;;  %v242_v1 = vadd.f32 %v485_v18, %v218_v63  ;;  %v246_v2 = vadd.f32 %v485_v18, %v228_v0 }
  0xc0   :  { %v293_v5 = vmax.f32 %v242_v1, 0.0  ;;  %v297_v6 = vmax.f32 %v246_v2, 0.0 }
  0xc2   :  { %v442_v7 = vpack.c.bf16 %v293_v5, %v292_v3  ;;  %v452_v8 = vpack.c.bf16 %v297_v6, %v296_v4 }
  0xc4   :  { %458 = vst [vmem:[%s584_s3 + $0x28] sm:$0xff] %v442_v7  }
  0xc5   :  { %460 = vst [vmem:[%s584_s3 + $0x38] sm:$0xff] %v452_v8  }

</bundles_post_ra>
